<compile_context>
chip_gen: v6e
topology: v6e:2x2x1
jax: 0.10.0
libtpu: 0.0.40
codegen_flags: <defaults>
</compile_context>

<pallas_src>
import jax
import jax.numpy as jnp
from jax.experimental import pallas as pl
from jax.experimental.pallas import tpu as pltpu

_EPS = 1e-5


def _round_up(x, m):
    return ((x + m - 1) // m) * m


# ----------------------------------------------------------------------------
# Pallas kernel 1 (stats pass): accumulate per-channel sum / sum-of-squares of
#   y = W^T @ x  over all (batch, token-tile) grid steps (reduction grid).
# ----------------------------------------------------------------------------
def _stats_kernel(x_ref, w_ref, sum_ref, sq_ref):
    @pl.when(jnp.logical_and(pl.program_id(0) == 0, pl.program_id(1) == 0))
    def _init():
        sum_ref[...] = jnp.zeros_like(sum_ref)
        sq_ref[...] = jnp.zeros_like(sq_ref)

    x = x_ref[0]                                                     # (Cin2, TM)
    y = jnp.dot(w_ref[...], x, preferred_element_type=jnp.float32)   # (Cout2, TM)
    sum_ref[...] += jnp.sum(y, axis=1, keepdims=True)                # (Cout2, 1)
    sq_ref[...] += jnp.sum(y * y, axis=1, keepdims=True)


# ----------------------------------------------------------------------------
# Pallas kernel 2 (apply pass): out = relu((W^T @ x) * scale + shift)
#   scale/shift are the folded BatchNorm affine; stores are lane-dense.
# ----------------------------------------------------------------------------
def _apply_kernel(x_ref, w_ref, scale_ref, shift_ref, o_ref):
    x = x_ref[0]                                                     # (Cin2, TM)
    y = jnp.dot(w_ref[...], x, preferred_element_type=jnp.float32)   # (Cout2, TM)
    y = y * scale_ref[...] + shift_ref[...]                          # (Cout2,1) lane-broadcast
    o_ref[0] = jnp.maximum(y, 0.0).astype(o_ref.dtype)


def conv_bn_relu_tokens(x3, w_t, gamma, beta, *, lane_tile=512):
    """x3: (N, Cin2, HW) f32 tokens; w_t: (Cout2, Cin2); -> (N, Cout2, HW)."""
    N, Cin2, HW = x3.shape
    Cout2 = w_t.shape[0]

    tm = min(lane_tile, _round_up(HW, 128))       # lane tile (multiple of 128)
    L = _round_up(HW, tm)
    if L != HW:                                   # zero-pad tokens: adds 0 to sums
        x3 = jnp.pad(x3, ((0, 0), (0, 0), (0, L - HW)))
    n_m = L // tm

    w_t = w_t.astype(jnp.float32)

    x_spec = pl.BlockSpec((1, Cin2, tm), lambda n, m: (n, 0, m))
    w_spec = pl.BlockSpec((Cout2, Cin2), lambda n, m: (0, 0))
    vec_spec = pl.BlockSpec((Cout2, 1), lambda n, m: (0, 0))

    # ---- pass 1: global training-mode batch statistics of y = W^T x ----
    y_sum, y_sq = pl.pallas_call(
        _stats_kernel,
        grid=(N, n_m),
        in_specs=[x_spec, w_spec],
        out_specs=[vec_spec, vec_spec],
        out_shape=[jax.ShapeDtypeStruct((Cout2, 1), jnp.float32),
                   jax.ShapeDtypeStruct((Cout2, 1), jnp.float32)],
        compiler_params=pltpu.CompilerParams(
            dimension_semantics=("arbitrary", "arbitrary")),
    )(x3, w_t)

    count = jnp.float32(N * HW)                   # true token count (padding excluded)
    mean = y_sum / count                          # (Cout2, 1)
    var = jnp.maximum(y_sq / count - mean * mean, 0.0)
    scale = gamma.reshape(Cout2, 1).astype(jnp.float32) * jax.lax.rsqrt(var + _EPS)
    shift = beta.reshape(Cout2, 1).astype(jnp.float32) - mean * scale

    # ---- pass 2: 1x1 conv + folded BN + ReLU, pipelined, megacore-parallel ----
    out3 = pl.pallas_call(
        _apply_kernel,
        grid=(N, n_m),
        in_specs=[x_spec, w_spec, vec_spec, vec_spec],
        out_specs=pl.BlockSpec((1, Cout2, tm), lambda n, m: (n, 0, m)),
        out_shape=jax.ShapeDtypeStruct((N, Cout2, L), jnp.float32),
        compiler_params=pltpu.CompilerParams(
            dimension_semantics=("parallel", "parallel")),
    )(x3, w_t, scale, shift)
    return out3[:, :, :HW]


# ----------------------------------------------------------------------------
# FourierUnit forward (fft glue + Pallas conv/BN/ReLU)
# ----------------------------------------------------------------------------
def fourier_unit(x_nchw, w_t, gamma, beta, *, lane_tile=512):
    N, C, H, W = x_nchw.shape
    pad_h, pad_w = H % 2, W % 2
    if pad_h or pad_w:
        x_nchw = jnp.pad(x_nchw, ((0, 0), (0, 0), (0, pad_h), (0, pad_w)),
                         mode="reflect")
    Hp, Wp = x_nchw.shape[2], x_nchw.shape[3]
    Wh = Wp // 2 + 1

    ff = jnp.fft.rfft2(x_nchw, norm="ortho")                       # (N, C, Hp, Wh) complex
    # torch.view_as_real + permute(0,1,4,2,3) + view -> channels [r0,i0,r1,i1,...]
    stacked = jnp.stack([ff.real, ff.imag], axis=2).reshape(N, 2 * C, Hp, Wh)

    x3 = stacked.reshape(N, 2 * C, Hp * Wh).astype(jnp.float32)    # tokens on lanes
    out3 = conv_bn_relu_tokens(x3, w_t, gamma, beta, lane_tile=lane_tile)
    Cout2 = out3.shape[1]
    Cout = Cout2 // 2

    out = out3.reshape(N, Cout, 2, Hp, Wh)
    comp = jax.lax.complex(out[:, :, 0], out[:, :, 1])
    y = jnp.fft.irfft2(comp, s=(Hp, Wp), norm="ortho")
    return y[:, :, :H, :W]


# ----------------------------------------------------------------------------
# pure-JAX reference (same semantics) for a correctness sanity check
# ----------------------------------------------------------------------------
def _reference(x, w_t, gamma, beta):
    N, C, H, W = x.shape            # even H, W in the test -> no pad branch
    Wh = W // 2 + 1
    ff = jnp.fft.rfft2(x, norm="ortho")
    st = jnp.stack([ff.real, ff.imag], axis=2).reshape(N, 2 * C, H, Wh)
    y = jnp.einsum("oc,nchw->nohw", w_t, st)
    mu = y.mean(axis=(0, 2, 3), keepdims=True)
    var = ((y - mu) ** 2).mean(axis=(0, 2, 3), keepdims=True)
    y = (y - mu) * jax.lax.rsqrt(var + _EPS) * gamma.reshape(1, -1, 1, 1) \
        + beta.reshape(1, -1, 1, 1)
    y = jnp.maximum(y, 0.0)
    Cout = y.shape[1] // 2
    y = y.reshape(N, Cout, 2, H, Wh)
    comp = jax.lax.complex(y[:, :, 0], y[:, :, 1])
    return jnp.fft.irfft2(comp, s=(H, W), norm="ortho")


if __name__ == "__main__":
    key = jax.random.PRNGKey(0)
    k_w, k_g, k_b, k_x = jax.random.split(key, 4)

    in_channels, out_channels = 4, 4
    Cin2, Cout2 = 2 * in_channels, 2 * out_channels

    # 1x1 conv weight stored pre-transposed: (Cout2, Cin2), bias=False
    w_t = 0.2 * jax.random.normal(k_w, (Cout2, Cin2), jnp.float32)
    gamma = 1.0 + 0.1 * jax.random.normal(k_g, (Cout2,), jnp.float32)
    beta = 0.1 * jax.random.normal(k_b, (Cout2,), jnp.float32)

    x = jax.random.normal(k_x, (2, 4, 16, 16), jnp.float32)

    fwd = jax.jit(fourier_unit)
    out = fwd(x, w_t, gamma, beta)
    jax.block_until_ready(out)

    assert out.shape == (2, 4, 16, 16)
    assert bool(jnp.all(jnp.isfinite(out)))

    ref = _reference(x, w_t, gamma, beta)
    assert bool(jnp.allclose(out, ref, rtol=1e-3, atol=1e-3)), \
        f"max abs diff = {float(jnp.max(jnp.abs(out - ref)))}"

    print("KERNEL_OK")
</pallas_src>

<mosaic_0001>
module attributes {stable_mosaic.version = 11 : i64} {
  func.func @_stats_kernel(%arg0: i32, %arg1: i32, %arg2: memref<1x8x256xf32, #tpu.memory_space<vmem>>, %arg3: memref<8x8xf32, #tpu.memory_space<vmem>>, %arg4: memref<8x1xf32, #tpu.memory_space<vmem>>, %arg5: memref<8x1xf32, #tpu.memory_space<vmem>>) attributes {dimension_semantics = [#tpu.dimension_semantics<arbitrary>, #tpu.dimension_semantics<arbitrary>], iteration_bounds = array<i64: 2, 1>, scalar_prefetch = 0 : i64, scratch_operands = 0 : i64, tpu.core_type = #tpu.core_type<tc>, window_params = [{transform_indices = @transform_0, window_bounds = array<i64: 1, 8, 256>}, {pipeline_mode = #tpu.pipeline_mode<synchronous>, transform_indices = @transform_1, window_bounds = array<i64: 8, 8>}, {pipeline_mode = #tpu.pipeline_mode<synchronous>, transform_indices = @transform_2, window_bounds = array<i64: 8, 1>}, {pipeline_mode = #tpu.pipeline_mode<synchronous>, transform_indices = @transform_3, window_bounds = array<i64: 8, 1>}]} {
    %c0_i32 = arith.constant 0 : i32
    %0 = arith.cmpi eq, %arg0, %c0_i32 : i32
    %c0_i32_0 = arith.constant 0 : i32
    %1 = arith.cmpi eq, %arg1, %c0_i32_0 : i32
    %2 = arith.andi %0, %1 : i1
    %3 = arith.extui %2 : i1 to i32
    %c0_i32_1 = arith.constant 0 : i32
    %4 = arith.cmpi ne, %3, %c0_i32_1 : i32
    scf.if %4 {
      %cst_16 = arith.constant 0.000000e+00 : f32
      %20 = vector.broadcast %cst_16 : f32 to vector<8x1xf32>
      %c0_17 = arith.constant 0 : index
      %c0_18 = arith.constant 0 : index
      %21 = vector.load %arg4[%c0_17, %c0_18] : memref<8x1xf32, #tpu.memory_space<vmem>>, vector<8x1xf32>
      tpu.vector_store %arg4[%c0_17, %c0_18], %20 {strides = array<i32>} : memref<8x1xf32, #tpu.memory_space<vmem>>, vector<8x1xf32>,
      %cst_19 = arith.constant 0.000000e+00 : f32
      %22 = vector.broadcast %cst_19 : f32 to vector<8x1xf32>
      %c0_20 = arith.constant 0 : index
      %c0_21 = arith.constant 0 : index
      %23 = vector.load %arg5[%c0_20, %c0_21] : memref<8x1xf32, #tpu.memory_space<vmem>>, vector<8x1xf32>
      tpu.vector_store %arg5[%c0_20, %c0_21], %22 {strides = array<i32>} : memref<8x1xf32, #tpu.memory_space<vmem>>, vector<8x1xf32>,
    } else {
    }
    %c0 = arith.constant 0 : index
    %c0_2 = arith.constant 0 : index
    %c0_3 = arith.constant 0 : index
    %5 = vector.load %arg2[%c0, %c0_2, %c0_3] : memref<1x8x256xf32, #tpu.memory_space<vmem>>, vector<1x8x256xf32>
    %6 = vector.shape_cast %5 : vector<1x8x256xf32> to vector<8x256xf32>
    %c0_4 = arith.constant 0 : index
    %c0_5 = arith.constant 0 : index
    %7 = vector.load %arg3[%c0_4, %c0_5] : memref<8x8xf32, #tpu.memory_space<vmem>>, vector<8x8xf32>
    %cst = arith.constant dense<0.000000e+00> : vector<8x256xf32>
    %8 = tpu.matmul %7, %6, %cst {dimension_numbers = #tpu.dot_dimension_numbers<[1], [0], [0], [1], [0, 0, 1, 1], [], []>} : vector<8x8xf32>, vector<8x256xf32>, vector<8x256xf32> -> vector<8x256xf32>
    %c0_6 = arith.constant 0 : index
    %c0_7 = arith.constant 0 : index
    %9 = vector.load %arg4[%c0_6, %c0_7] : memref<8x1xf32, #tpu.memory_space<vmem>>, vector<8x1xf32>
    %cst_8 = arith.constant dense<0.000000e+00> : vector<8xf32>
    %10 = vector.multi_reduction <add>, %8, %cst_8 [1] : vector<8x256xf32> to vector<8xf32>
    %11 = vector.shape_cast %10 : vector<8xf32> to vector<8x1xf32>
    %12 = arith.addf %9, %11 : vector<8x1xf32>
    %c0_9 = arith.constant 0 : index
    %c0_10 = arith.constant 0 : index
    %13 = vector.load %arg4[%c0_9, %c0_10] : memref<8x1xf32, #tpu.memory_space<vmem>>, vector<8x1xf32>
    tpu.vector_store %arg4[%c0_9, %c0_10], %12 {strides = array<i32>} : memref<8x1xf32, #tpu.memory_space<vmem>>, vector<8x1xf32>,
    %c0_11 = arith.constant 0 : index
    %c0_12 = arith.constant 0 : index
    %14 = vector.load %arg5[%c0_11, %c0_12] : memref<8x1xf32, #tpu.memory_space<vmem>>, vector<8x1xf32>
    %15 = arith.mulf %8, %8 : vector<8x256xf32>
    %cst_13 = arith.constant dense<0.000000e+00> : vector<8xf32>
    %16 = vector.multi_reduction <add>, %15, %cst_13 [1] : vector<8x256xf32> to vector<8xf32>
    %17 = vector.shape_cast %16 : vector<8xf32> to vector<8x1xf32>
    %18 = arith.addf %14, %17 : vector<8x1xf32>
    %c0_14 = arith.constant 0 : index
    %c0_15 = arith.constant 0 : index
    %19 = vector.load %arg5[%c0_14, %c0_15] : memref<8x1xf32, #tpu.memory_space<vmem>>, vector<8x1xf32>
    tpu.vector_store %arg5[%c0_14, %c0_15], %18 {strides = array<i32>} : memref<8x1xf32, #tpu.memory_space<vmem>>, vector<8x1xf32>,
    return
  }
  func.func @transform_0(%arg0: i32, %arg1: i32) -> (i32, i32, i32) {
    %c0_i32 = arith.constant 0 : i32
    %c0_i32_0 = arith.constant 0 : i32
    return %arg0, %c0_i32, %arg1 : i32, i32, i32
  }
  func.func @transform_1(%arg0: i32, %arg1: i32) -> (i32, i32) {
    %c0_i32 = arith.constant 0 : i32
    %c0_i32_0 = arith.constant 0 : i32
    %c0_i32_1 = arith.constant 0 : i32
    return %c0_i32, %c0_i32_0 : i32, i32
  }
  func.func @transform_2(%arg0: i32, %arg1: i32) -> (i32, i32) {
    %c0_i32 = arith.constant 0 : i32
    %c0_i32_0 = arith.constant 0 : i32
    %c0_i32_1 = arith.constant 0 : i32
    return %c0_i32, %c0_i32_0 : i32, i32
  }
  func.func @transform_3(%arg0: i32, %arg1: i32) -> (i32, i32) {
    %c0_i32 = arith.constant 0 : i32
    %c0_i32_0 = arith.constant 0 : i32
    %c0_i32_1 = arith.constant 0 : i32
    return %c0_i32, %c0_i32_0 : i32, i32
  }
}

module attributes {stable_mosaic.version = 11 : i64} {
  func.func @_apply_kernel(%arg0: i32, %arg1: i32, %arg2: memref<1x8x256xf32, #tpu.memory_space<vmem>>, %arg3: memref<8x8xf32, #tpu.memory_space<vmem>>, %arg4: memref<8x1xf32, #tpu.memory_space<vmem>>, %arg5: memref<8x1xf32, #tpu.memory_space<vmem>>, %arg6: memref<1x8x256xf32, #tpu.memory_space<vmem>>) attributes {dimension_semantics = [#tpu.dimension_semantics<parallel>, #tpu.dimension_semantics<parallel>], iteration_bounds = array<i64: 2, 1>, scalar_prefetch = 0 : i64, scratch_operands = 0 : i64, tpu.core_type = #tpu.core_type<tc>, window_params = [{transform_indices = @transform_0, window_bounds = array<i64: 1, 8, 256>}, {pipeline_mode = #tpu.pipeline_mode<synchronous>, transform_indices = @transform_1, window_bounds = array<i64: 8, 8>}, {pipeline_mode = #tpu.pipeline_mode<synchronous>, transform_indices = @transform_2, window_bounds = array<i64: 8, 1>}, {pipeline_mode = #tpu.pipeline_mode<synchronous>, transform_indices = @transform_3, window_bounds = array<i64: 8, 1>}, {transform_indices = @transform_4, window_bounds = array<i64: 1, 8, 256>}]} {
    %c0 = arith.constant 0 : index
    %c0_0 = arith.constant 0 : index
    %c0_1 = arith.constant 0 : index
    %0 = vector.load %arg2[%c0, %c0_0, %c0_1] : memref<1x8x256xf32, #tpu.memory_space<vmem>>, vector<1x8x256xf32>
    %1 = vector.shape_cast %0 : vector<1x8x256xf32> to vector<8x256xf32>
    %c0_2 = arith.constant 0 : index
    %c0_3 = arith.constant 0 : index
    %2 = vector.load %arg3[%c0_2, %c0_3] : memref<8x8xf32, #tpu.memory_space<vmem>>, vector<8x8xf32>
    %cst = arith.constant dense<0.000000e+00> : vector<8x256xf32>
    %3 = tpu.matmul %2, %1, %cst {dimension_numbers = #tpu.dot_dimension_numbers<[1], [0], [0], [1], [0, 0, 1, 1], [], []>} : vector<8x8xf32>, vector<8x256xf32>, vector<8x256xf32> -> vector<8x256xf32>
    %c0_4 = arith.constant 0 : index
    %c0_5 = arith.constant 0 : index
    %4 = vector.load %arg4[%c0_4, %c0_5] : memref<8x1xf32, #tpu.memory_space<vmem>>, vector<8x1xf32>
    %5 = vector.broadcast %4 : vector<8x1xf32> to vector<8x256xf32>
    %6 = arith.mulf %3, %5 : vector<8x256xf32>
    %c0_6 = arith.constant 0 : index
    %c0_7 = arith.constant 0 : index
    %7 = vector.load %arg5[%c0_6, %c0_7] : memref<8x1xf32, #tpu.memory_space<vmem>>, vector<8x1xf32>
    %8 = vector.broadcast %7 : vector<8x1xf32> to vector<8x256xf32>
    %9 = arith.addf %6, %8 : vector<8x256xf32>
    %cst_8 = arith.constant 0.000000e+00 : f32
    %10 = vector.broadcast %cst_8 : f32 to vector<8x256xf32>
    %11 = arith.maximumf %9, %10 : vector<8x256xf32>
    %c0_9 = arith.constant 0 : index
    %c0_10 = arith.constant 0 : index
    %c0_11 = arith.constant 0 : index
    %12 = vector.load %arg6[%c0_9, %c0_10, %c0_11] : memref<1x8x256xf32, #tpu.memory_space<vmem>>, vector<1x8x256xf32>
    %13 = vector.shape_cast %12 : vector<1x8x256xf32> to vector<8x256xf32>
    %14 = vector.shape_cast %11 : vector<8x256xf32> to vector<1x8x256xf32>
    tpu.vector_store %arg6[%c0_9, %c0_10, %c0_11], %14 {strides = array<i32>} : memref<1x8x256xf32, #tpu.memory_space<vmem>>, vector<1x8x256xf32>,
    return
  }
  func.func @transform_0(%arg0: i32, %arg1: i32) -> (i32, i32, i32) {
    %c0_i32 = arith.constant 0 : i32
    %c0_i32_0 = arith.constant 0 : i32
    return %arg0, %c0_i32, %arg1 : i32, i32, i32
  }
  func.func @transform_1(%arg0: i32, %arg1: i32) -> (i32, i32) {
    %c0_i32 = arith.constant 0 : i32
    %c0_i32_0 = arith.constant 0 : i32
    %c0_i32_1 = arith.constant 0 : i32
    return %c0_i32, %c0_i32_0 : i32, i32
  }
  func.func @transform_2(%arg0: i32, %arg1: i32) -> (i32, i32) {
    %c0_i32 = arith.constant 0 : i32
    %c0_i32_0 = arith.constant 0 : i32
    %c0_i32_1 = arith.constant 0 : i32
    return %c0_i32, %c0_i32_0 : i32, i32
  }
  func.func @transform_3(%arg0: i32, %arg1: i32) -> (i32, i32) {
    %c0_i32 = arith.constant 0 : i32
    %c0_i32_0 = arith.constant 0 : i32
    %c0_i32_1 = arith.constant 0 : i32
    return %c0_i32, %c0_i32_0 : i32, i32
  }
  func.func @transform_4(%arg0: i32, %arg1: i32) -> (i32, i32, i32) {
    %c0_i32 = arith.constant 0 : i32
    %c0_i32_0 = arith.constant 0 : i32
    return %arg0, %c0_i32, %arg1 : i32, i32, i32
  }
}

</mosaic_0001>

<bundles_post_ra>
// kernel: reverse.0
= control target key start
LH: loop header
LB: loop body
LE: loop exit
PB: predicated region body
PF: predicated region fallthrough
CT: control target
= control target key end

     0   :  { %v72_v3 = vlaneseq  ;;  %v65_v9 = vld [vmem:[#allocation0 + $0x7] ss:$-1 sm:$0xff]  ;;  %v79_v12 = vld [vmem:[#allocation0 + $0x17] ss:$-1 sm:$0xff]  ;;  %s331_s0 = inlined_call_operand.vmem [shape: f32[2,4,16,7], index: 0, kind: input, shape index: {}]   ;;  %s332_s1 = inlined_call_operand.vmem [shape: f32[2,4,16,7], index: 1, kind: output, shape index: {}]  }
   0x1   :  { %v45_v0 = vld [vmem:[%s331_s0] sm:$0xff]  ;;  %v47_v1 = vld [vmem:[%s331_s0 + $0x8] sm:$0xff]  ;;  %v49_v2 = vld [vmem:[%s331_s0 + $0x10] sm:$0xff]  ;;  %v66_v10 = vrot.slane %v65_v9, 1  ;;  %v80_v14 = vrot.slane %v79_v12, 1 }
   0x2   :  { %46 = vst [vmem:[#allocation0 + $0x8] sm:$0xff] %v45_v0  ;;  %48 = vst [vmem:[#allocation0 + $0x18] sm:$0xff] %v47_v1  ;;  %v51_v4 = vld [vmem:[%s331_s0 + $0x18] sm:$0xff]  ;;  %v53_v5 = vld [vmem:[%s331_s0 + $0x20] sm:$0xff]  ;;  %v73_v11 = vshrl.u32 %v72_v3, 7 }
   0x3   :  { %50 = vst [vmem:[#allocation0 + $0x28] sm:$0xff] %v49_v2  ;;  %v55_v6 = vld [vmem:[%s331_s0 + $0x28] sm:$0xff]  ;;  %52 = vst [vmem:[#allocation0 + $0x38] sm:$0xff] %v51_v4  ;;  %v57_v7 = vld [vmem:[%s331_s0 + $0x30] sm:$0xff] }
   0x4   :  { %54 = vst [vmem:[#allocation0 + $0x48] sm:$0xff] %v53_v5  ;;  %56 = vst [vmem:[#allocation0 + $0x58] sm:$0xff] %v55_v6  ;;  %v59_v8 = vld [vmem:[%s331_s0 + $0x38] sm:$0xff]  ;;  %v93_v13 = vld [vmem:[#allocation0 + $0x27] ss:$-1 sm:$0xff]  ;;  %vm74_vm0 = vcmp.lt.s32.totalorder %v73_v11, 7 }
   0x5   :  { %58 = vst [vmem:[#allocation0 + $0x68] sm:$0xff] %v57_v7  ;;  %60 = vst [vmem:[#allocation0 + $0x78] sm:$0xff] %v59_v8  ;;  %v94_v15 = vrot.slane %v93_v13, 1  ;;  %v107_v16 = vld [vmem:[#allocation0 + $0x37] ss:$-1 sm:$0xff] }
   0x6   :  { %67 = vst [vmem:[#allocation1] sm:$0xff] %v66_v10  ;;  %v108_v17 = vrot.slane %v107_v16, 1  ;;  %v121_v18 = vld [vmem:[#allocation0 + $0x47] ss:$-1 sm:$0xff]  ;;  %v135_v19 = vld [vmem:[#allocation0 + $0x57] ss:$-1 sm:$0xff] }
   0x7   :  { %81 = vst [vmem:[#allocation1 + $0x8] sm:$0xff] %v80_v14  ;;  %95 = vst [vmem:[#allocation1 + $0x10] sm:$0xff] %v94_v15  ;;  %v122_v20 = vrot.slane %v121_v18, 1  ;;  %v136_v21 = vrot.slane %v135_v19, 1  ;;  %v149_v22 = vld [vmem:[#allocation0 + $0x67] ss:$-1 sm:$0xff] }
   0x8   :  { %v163_v23 = vld [vmem:[#allocation0 + $0x77] ss:$-1 sm:$0xff]  ;;  %109 = vst [vmem:[#allocation1 + $0x18] sm:$0xff] %v108_v17  ;;  %v150_v24 = vrot.slane %v149_v22, 1 }
   0x9   :  { %v164_v25 = vrot.slane %v163_v23, 1  ;;  %v70_v26 = vld [vmem:[#allocation0 + $0xf] ss:$-1 sm:$0xff]  ;;  %v84_v27 = vld [vmem:[#allocation0 + $0x1f] ss:$-1 sm:$0xff]  ;;  %123 = vst [vmem:[#allocation1 + $0x20] sm:$0xff] %v122_v20 }
   0xa   :  { %v98_v28 = vld [vmem:[#allocation0 + $0x2f] ss:$-1 sm:$0xff]  ;;  %137 = vst [vmem:[#allocation1 + $0x28] sm:$0xff] %v136_v21  ;;  %v71_v29 = vrot.slane %v70_v26, 1  ;;  %v85_v30 = vrot.slane %v84_v27, 1  ;;  %151 = vst [vmem:[#allocation1 + $0x30] sm:$0xff] %v150_v24 }
   0xb   :  { %v99_v31 = vrot.slane %v98_v28, 1  ;;  %v112_v32 = vld [vmem:[#allocation0 + $0x3f] ss:$-1 sm:$0xff]  ;;  %165 = vst [vmem:[#allocation1 + $0x38] sm:$0xff] %v164_v25  ;;  %v126_v34 = vld [vmem:[#allocation0 + $0x4f] ss:$-1 sm:$0xff] }
   0xc   :  { %v113_v33 = vrot.slane %v112_v32, 1  ;;  %v140_v35 = vld [vmem:[#allocation0 + $0x5f] ss:$-1 sm:$0xff]  ;;  %75 = vst.msk [vmem:[#allocation1] sm:$0xff] %vm74_vm0, %v71_v29  ;;  %89 = vst.msk [vmem:[#allocation1 + $0x8] sm:$0xff] %vm74_vm0, %v85_v30  ;;  %v127_v36 = vrot.slane %v126_v34, 1 }
   0xd   :  { %103 = vst.msk [vmem:[#allocation1 + $0x10] sm:$0xff] %vm74_vm0, %v99_v31  ;;  %v141_v37 = vrot.slane %v140_v35, 1  ;;  %v154_v38 = vld [vmem:[#allocation0 + $0x6f] ss:$-1 sm:$0xff]  ;;  %v168_v39 = vld [vmem:[#allocation0 + $0x7f] ss:$-1 sm:$0xff] }
   0xe   :  { %117 = vst.msk [vmem:[#allocation1 + $0x18] sm:$0xff] %vm74_vm0, %v113_v33  ;;  %v155_v40 = vrot.slane %v154_v38, 1  ;;  %v169_v41 = vrot.slane %v168_v39, 1  ;;  %131 = vst.msk [vmem:[#allocation1 + $0x20] sm:$0xff] %vm74_vm0, %v127_v36 }
   0xf   :  { %145 = vst.msk [vmem:[#allocation1 + $0x28] sm:$0xff] %vm74_vm0, %v141_v37 }
  0x10   :  { %159 = vst.msk [vmem:[#allocation1 + $0x30] sm:$0xff] %vm74_vm0, %v155_v40  ;;  %173 = vst.msk [vmem:[#allocation1 + $0x38] sm:$0xff] %vm74_vm0, %v169_v41 }
  0x13   :  { %v216_v42 = vld [vmem:[#allocation1] sm:$0xff]  ;;  %v218_v43 = vld [vmem:[#allocation1 + $0x8] sm:$0xff] }
  0x14   :  { %v220_v44 = vld [vmem:[#allocation1 + $0x10] sm:$0xff]  ;;  %217 = vst [vmem:[%s332_s1] sm:$0xff] %v216_v42  ;;  %219 = vst [vmem:[%s332_s1 + $0x8] sm:$0xff] %v218_v43 }
  0x15   :  { %221 = vst [vmem:[%s332_s1 + $0x10] sm:$0xff] %v220_v44  ;;  %v222_v45 = vld [vmem:[#allocation1 + $0x18] sm:$0xff]  ;;  %v224_v46 = vld [vmem:[#allocation1 + $0x20] sm:$0xff] }
  0x16   :  { %223 = vst [vmem:[%s332_s1 + $0x18] sm:$0xff] %v222_v45  ;;  %v226_v47 = vld [vmem:[#allocation1 + $0x28] sm:$0xff]  ;;  %225 = vst [vmem:[%s332_s1 + $0x20] sm:$0xff] %v224_v46 }
  0x17   :  { %227 = vst [vmem:[%s332_s1 + $0x28] sm:$0xff] %v226_v47  ;;  %v228_v48 = vld [vmem:[#allocation1 + $0x30] sm:$0xff]  ;;  %v230_v49 = vld [vmem:[#allocation1 + $0x38] sm:$0xff] }
  0x18   :  { %229 = vst [vmem:[%s332_s1 + $0x30] sm:$0xff] %v228_v48  ;;  %231 = vst [vmem:[%s332_s1 + $0x38] sm:$0xff] %v230_v49 }

// kernel: fourier_unit.3
= control target key start
LH: loop header
LB: loop body
LE: loop exit
PB: predicated region body
PF: predicated region fallthrough
CT: control target
= control target key end

     0   :  { %s514_s15 = smov 0   ;;  %s516_s16 = smov 0   ;;  %s556_s0 = inlined_call_operand.vmem [shape: f32[2,8,256], index: 0, kind: input, shape index: {}]   ;;  %s557_s1 = inlined_call_operand.vmem [shape: f32[8,8], index: 1, kind: input, shape index: {}]   ;;  %s558_s2 = inlined_call_operand.vmem [shape: f32[8,1], index: 2, kind: input, shape index: {}]   ;;  %s559_s3 = inlined_call_operand.vmem [shape: f32[8,1], index: 3, kind: input, shape index: {}]   ;;  %s560_s4 = inlined_call_operand.vmem [shape: f32[2,8,256], index: 4, kind: output, shape index: {}]  }
   0x1   :  { %s518_s17 = smov 0  }
   0x2 LB: > { %s26_s18 = sadd.s32 1, %s481_s16  ;;  %p426_p0 = scmp.ge.s32.totalorder %s485_s17, 1  ;;  %s485_s17 = sphi %s518_s17, %s14_s17   ;;  %s481_s16 = sphi %s516_s16, %s562_s16   ;;  %s477_s15 = sphi %s514_s15, %s561_s15  }
   0x3   : > { %p28_p1 = scmp.ge.s32.totalorder %s26_s18, 2  ;;  %p183_p2 = scmp.lt.s32.totalorder %s485_s17, 3 }
   0x5   : > { %s564_s18 = smov (%p28_p1, %s26_s18), 0  ;;  %p184_p3 = pnand %p426_p0, %p183_p2 }
   0x6   : > { %p218_p4 = scmp.lt.s32.totalorder (!%p184_p3), %s477_s15, 1 }
   0x7   : > { %187 = sbr.rel (%p184_p3) target bundleno = 220 (0xdc), region = 36 }
   0xc   : > { %v315_v0 = vld [vmem:[%s558_s2] sm:$0xff]  ;;  %v487_v1 = vmov 0.0   ;;  %v488_v2 = vmov 0   ;;  %s566_s15 = smov (!%p218_p4, %s477_s15), 1  ;;  %vm240_vm0 = vcmask 64512  }
   0xd   : > { %308 = vmatprep.mubr.f32.mxu0 %v487_v1  ;;  %462 = vset.pattern.permute.xlu0 %v488_v2  ;;  %v323_v3 = vld [vmem:[%s559_s3] sm:$0xff]  ;;  %s434_s23 = sshll.u32 %s566_s15, 4 }
   0xe   : > { %318 = vperm.xlu0 %462, %v315_v0   ;;  %s225_s26 = scalar_lea.vmem %s556_s0, %s434_s23  ;;  %v239_v6 = vld [vmem:[%s557_s1] sm:$0xff]  ;;  %s235_s5 = scalar_lea.vmem %s560_s4, %s434_s23 }
   0xf   : > { %v238_v4 = vld [vmem:[%s225_s26 + $0x8] sm:$0xff]  ;;  %v237_v5 = vld [vmem:[%s225_s26] sm:$0xff] }
  0x10   : > { %274 = vmatprep.subr.mxu0 %v238_v4 }
  0x11   : > { %275 = vmatpush1.msra.mxu0 %v237_v5 }
  0x12   : > { %326 = vperm.xlu0 %462, %v323_v3   ;;  %431 = vmatmul.mubr.msk.f32.vlgmr.msra.gmra.mxu0 %vm240_vm0, %v239_v6 }
  0x89   : > { %v319_v7 = vpop.permute.xlu0 %318 }
  0x8d   : > { %v327_v10 = vpop.permute.xlu0 %326 }
  0xd2   : > { %v310_v8 = vpop.f32.mrf.mxu0 }
  0xd3   : > { %v321_v9 = vmul.f32 %v319_v7, %v310_v8 }
  0xd4   : > { %v312_v11 = vpop.f32.mrf.mxu0 }
  0xd5   : > { %v329_v12 = vadd.f32 %v327_v10, %v321_v9  ;;  %v322_v13 = vmul.f32 %v319_v7, %v312_v11 }
  0xd7   : > { %v331_v14 = vmax.f32 %v329_v12, 0.0  ;;  %v330_v15 = vadd.f32 %v327_v10, %v322_v13 }
  0xd9   : > { %333 = vst [vmem:[%s235_s5] sm:$0xff] %v331_v14  ;;  %v332_v16 = vmax.f32 %v330_v15, 0.0 }
  0xdb   : > { %334 = vst [vmem:[%s235_s5 + $0x8] sm:$0xff] %v332_v16 }
  0xdc PF: > { %s14_s17 = sadd.s32 1, %s485_s17   ;;  %s561_s15 = smov %s481_s16 }
  0xdd   : > { %p11_p5 = scmp.ge.s32.totalorder %s14_s17, 4   ;;  %s562_s16 = smov %s564_s18 }
  0xdf   :  { %13 = sbr.rel (!%p11_p5) target bundleno = 2 (0x2), region = 66 }

// kernel: fourier_unit.2
= control target key start
LH: loop header
LB: loop body
LE: loop exit
PB: predicated region body
PF: predicated region fallthrough
CT: control target
= control target key end

     0   :  { %s416_s12 = smov 0   ;;  %s418_s13 = smov 0   ;;  %s467_s0 = inlined_call_operand.vmem [shape: f32[2,8,256], index: 0, kind: input, shape index: {}]   ;;  %s468_s1 = inlined_call_operand.vmem [shape: f32[8,8], index: 1, kind: input, shape index: {}]   ;;  %s469_s2 = inlined_call_operand.vmem [shape: f32[8,1], index: 2, kind: output, shape index: {0}]   ;;  %s470_s3 = inlined_call_operand.vmem [shape: f32[8,1], index: 3, kind: output, shape index: {1}]  }
   0x1   :  { %s420_s14 = smov 0  }
   0x2 LB: > { %s26_s15 = sadd.s32 1, %s388_s13  ;;  %p335_p0 = scmp.ge.s32.totalorder %s392_s14, 1  ;;  %s392_s14 = sphi %s420_s14, %s14_s14   ;;  %s388_s13 = sphi %s418_s13, %s472_s13   ;;  %s384_s12 = sphi %s416_s12, %s471_s12  }
   0x3   : > { %p28_p1 = scmp.ge.s32.totalorder %s26_s15, 2  ;;  %p149_p2 = scmp.lt.s32.totalorder %s392_s14, 3 }
   0x5   : > { %s474_s15 = smov (%p28_p1, %s26_s15), 0  ;;  %p150_p3 = pnand %p335_p0, %p149_p2 }
   0x6   : > { %p173_p4 = scmp.lt.s32.totalorder (!%p150_p3), %s384_s12, 1  ;;  %p182_p5 = scmp.eq.s32.totalorder (!%p150_p3), %s384_s12, 0 }
   0x7   : > { %153 = sbr.rel (%p150_p3) target bundleno = 362 (0x16a), region = 28 }
   0xc   : > { %s476_s12 = smov (!%p173_p4, %s384_s12), 1  ;;  %187 = sbr.rel (!%p182_p5) target bundleno = 17 (0x11), region = 32  ;;  %vm188_vm0 = vcmask (%p182_p5), 7168   ;;  %v394_v0 = vmov (%p182_p5), 0.0  }
   0xd   : > { %s342_s16 = sshll.u32 %s476_s12, 4  ;;  %189 = vst.msk [vmem:[%s469_s2] sm:$0xff] (%p182_p5), %vm188_vm0, %v394_v0  ;;  %190 = vst.msk [vmem:[%s470_s3] sm:$0xff] (%p182_p5), %vm188_vm0, %v394_v0 }
   0xe   : > { %s180_s19 = scalar_lea.vmem %s467_s0, %s342_s16 }
  0x11 PF: > { %v192_v1 = vld [vmem:[%s180_s19 + $0x8] sm:$0xff]  ;;  %v191_v2 = vld [vmem:[%s180_s19] sm:$0xff]  ;;  %vm194_vm1 = vcmask 64512   ;;  %v395_v4 = vmov 0.0   ;;  %vm274_vm2 = vcmask 7168  }
  0x12   : > { %v193_v3 = vld [vmem:[%s468_s1] sm:$0xff]  ;;  %228 = vmatprep.subr.mxu0 %v192_v1  ;;  %262 = vmatprep.mubr.f32.mxu0 %v395_v4 }
  0x13   : > { %229 = vmatpush1.msra.mxu0 %v191_v2 }
  0x14   : > { %339 = vmatmul.mubr.msk.f32.vlgmr.msra.gmra.mxu0 %vm194_vm1, %v193_v3  ;;  %v269_v11 = vld [vmem:[%s469_s2] sm:$0xff] }
  0x15   : > { %v276_v14 = vld [vmem:[%s470_s3] sm:$0xff] }
  0xd4   : > { %v264_v5 = vpop.f32.mrf.mxu0 }
  0xd5   : > { %v277_v9 = vmul.f32 %v264_v5, %v264_v5 }
  0xd6   : > { %v266_v6 = vpop.f32.mrf.mxu0 }
  0xd7   : > { %v278_v7 = vmul.f32 %v266_v6, %v266_v6  ;;  %v270_v8 = vadd.f32 %v266_v6, %v264_v5 }
  0xd9   : > { %271 = vadd.xlane.f32.xlu0 %v270_v8  ;;  %v279_v10 = vadd.f32 %v278_v7, %v277_v9 }
  0xdd   : > { %280 = vadd.xlane.f32.xlu0 %v279_v10 }
 0x162   : > { %v272_v12 = vpop.xlane.xlu0 %271 }
 0x163   : > { %v273_v13 = vadd.f32 %v272_v12, %v269_v11 }
 0x165   : > { %275 = vst.msk [vmem:[%s469_s2] sm:$0xff] %vm274_vm2, %v273_v13 }
 0x166   : > { %v281_v15 = vpop.xlane.xlu0 %280 }
 0x167   : > { %v282_v16 = vadd.f32 %v281_v15, %v276_v14 }
 0x169   : > { %283 = vst.msk [vmem:[%s470_s3] sm:$0xff] %vm274_vm2, %v282_v16 }
 0x16a PF: > { %s14_s14 = sadd.s32 1, %s392_s14   ;;  %s471_s12 = smov %s388_s13 }
 0x16b   : > { %p11_p6 = scmp.ge.s32.totalorder %s14_s14, 4   ;;  %s472_s13 = smov %s474_s15 }
 0x16d   :  { %13 = sbr.rel (!%p11_p6) target bundleno = 2 (0x2), region = 66 }

</bundles_post_ra>
